<compile_context>
chip_gen: v7x
topology: tpu7x:2x2x1
jax: 0.10.0
libtpu: 0.0.40
codegen_flags: <defaults>
</compile_context>

<pallas_src>
import jax
import jax.numpy as jnp
from jax import lax
from jax.experimental import pallas as pl
from jax.experimental.pallas import tpu as pltpu


HIDDEN = 128  # fixed by the module definition


def _round_up(n, m):
    return (n + m - 1) // m * m


def _disc_kernel(x_ref, w1_ref, bw_ref, b2_ref, o_ref):
    # x_ref:  (tb, F)    activation tile (batch on sublanes, features on lanes)
    # w1_ref: (F, 128)   layer-1 weights, resident across the grid
    # bw_ref: (2, 128)   row 0 = b1, row 1 = w2 (stored as a row)
    # b2_ref: (1,) SMEM  layer-2 bias scalar
    # o_ref:  (1, tb)    output row, batch on lanes (lane-dense store)

    # Linear 1 on the MXU, f32 accumulate, + bias (VPU, (1,128) sublane-broadcast).
    h = jnp.dot(x_ref[...], w1_ref[...], preferred_element_type=jnp.float32)
    bw = bw_ref[...]
    h = h + bw[0:1, :]

    # LeakyReLU(negative_slope=0.01) on the VPU.
    h = jnp.where(h > 0, h, 0.01 * h)

    # Linear 2: contract dim 1 of w2_row (1,128) with dim 1 of h (tb,128) ->
    # (1, tb).  Batch lands on lanes (lane-dense store) and the rhs transpose is
    # folded into the MXU feed instead of an XLU vxpose of h.
    logit = lax.dot_general(
        bw[1:2, :], h,
        dimension_numbers=(((1,), (1,)), ((), ())),
        preferred_element_type=jnp.float32)
    logit = logit + b2_ref[0]

    # Numerically-stable sigmoid (== jax.nn.sigmoid): exp() only ever sees a
    # non-positive argument, so no overflow for large-magnitude logits.
    pos = logit >= 0
    z = jnp.exp(jnp.where(pos, -logit, logit))
    sig = jnp.where(pos, 1.0 / (1.0 + z), z / (1.0 + z))

    o_ref[...] = sig.astype(o_ref.dtype)


def _choose_batch_tile(B, tile_b):
    # A single full-extent block has no (8,128) alignment constraints; use it
    # for small batches.  Otherwise pick a 128-aligned tile capped near B/2 so
    # the grid has >= 2 steps (keeps both v7x TensorCores fed via "parallel").
    if B <= 128:
        return B
    tb = min(tile_b, pl.cdiv(B, 2))
    return _round_up(max(tb, 128), 128)


def discriminator_forward(x, w1, b1, w2, b2, *, tile_b=512):
    """x: [B, F]. Returns [B, 1] float32, matching the PyTorch forward.

    Pass bf16 x (and bf16 w1) to halve the dominant x HBM traffic; bias,
    LeakyReLU and sigmoid stay in f32 regardless of the input dtype.
    """
    B, F = x.shape
    assert w1.shape == (F, HIDDEN) and b1.shape == (HIDDEN,)
    assert w2.shape == (HIDDEN, 1) and b2.shape == (1,)

    w1 = w1.astype(x.dtype)

    # Fast path: lane-aligned feature dim -> x streams unpadded (zero extra HBM
    # passes).  Fallback keeps correctness for ragged F at the cost of one pad.
    # TODO(synk): have the producer emit lane-padded features so this pad fuses upstream.
    if F % 128 != 0:
        Fp = _round_up(F, 128)
        x = jnp.pad(x, ((0, 0), (0, Fp - F)))
        w1 = jnp.pad(w1, ((0, Fp - F), (0, 0)))
        F = Fp

    tb = _choose_batch_tile(B, tile_b)
    grid = (pl.cdiv(B, tb),)

    # Pack the two tiny resident row-operands into one (2, 128) array.
    bw_pack = jnp.stack(
        [b1.astype(jnp.float32), w2.reshape(HIDDEN).astype(jnp.float32)], axis=0)
    b2_vec = b2.astype(jnp.float32)  # (1,) scalar -> SMEM

    itemsize = x.dtype.itemsize
    cost = pl.CostEstimate(
        flops=2 * B * F * HIDDEN + 2 * B * HIDDEN,
        transcendentals=B,
        bytes_accessed=B * F * itemsize + F * HIDDEN * itemsize + B * 4,
    )

    out_row = pl.pallas_call(
        _disc_kernel,
        out_shape=jax.ShapeDtypeStruct((1, B), jnp.float32),
        grid_spec=pltpu.PrefetchScalarGridSpec(
            num_scalar_prefetch=0,
            grid=grid,
            in_specs=[
                pl.BlockSpec((tb, F), lambda i: (i, 0)),             # x tile (streams)
                pl.BlockSpec((F, HIDDEN), lambda i: (0, 0)),         # W1 (resident)
                pl.BlockSpec((2, HIDDEN), lambda i: (0, 0)),         # [b1; w2] rows
                pl.BlockSpec(memory_space=pltpu.MemorySpace.SMEM),   # b2 scalar
            ],
            out_specs=pl.BlockSpec((1, tb), lambda i: (0, i)),       # lane-dense out
        ),
        compiler_params=pltpu.CompilerParams(
            dimension_semantics=("parallel",),   # megacore-shardable batch axis
        ),
        cost_estimate=cost,
    )(x, w1, bw_pack, b2_vec)

    # Free layout plumbing: (1, B) row -> (B, 1) column.
    return out_row.reshape(B, 1)


def init_params(key, in_feature):
    """Deterministic PyTorch-style init: U(-1/sqrt(fan_in), 1/sqrt(fan_in))."""
    k1, k2, k3, k4 = jax.random.split(key, 4)
    bound1 = 1.0 / jnp.sqrt(in_feature)
    bound2 = 1.0 / jnp.sqrt(HIDDEN)
    # stored as [in, out] (transposed vs. torch's [out, in])
    w1 = jax.random.uniform(k1, (in_feature, HIDDEN), jnp.float32, -bound1, bound1)
    b1 = jax.random.uniform(k2, (HIDDEN,), jnp.float32, -bound1, bound1)
    w2 = jax.random.uniform(k3, (HIDDEN, 1), jnp.float32, -bound2, bound2)
    b2 = jax.random.uniform(k4, (1,), jnp.float32, -bound2, bound2)
    return w1, b1, w2, b2


def reference_forward(x, w1, b1, w2, b2):
    h = x @ w1 + b1
    h = jnp.where(h > 0, h, 0.01 * h)
    return jax.nn.sigmoid(h @ w2 + b2)


if __name__ == "__main__":
    key = jax.random.PRNGKey(0)
    kx, kp = jax.random.split(key)

    batch = 300        # ragged batch: 2 grid steps at tb=256, tail rows discarded
    in_feature = 256   # lane-aligned: exercises the zero-copy (no pad/astype) x path

    x = jax.random.normal(kx, (batch, in_feature), dtype=jnp.float32)
    w1, b1, w2, b2 = init_params(kp, in_feature)

    out = discriminator_forward(x, w1, b1, w2, b2)
    out = jax.block_until_ready(out)

    ref = reference_forward(x, w1, b1, w2, b2)
    assert out.shape == (batch, 1)
    assert jnp.allclose(out, ref, atol=5e-5, rtol=5e-5), "mismatch vs JAX reference"

    print("KERNEL_OK")
</pallas_src>

<mosaic_0001>
module attributes {stable_mosaic.version = 11 : i64} {
  func.func @_disc_kernel(%arg0: i32, %arg1: memref<256x256xf32, #tpu.memory_space<vmem>>, %arg2: memref<256x128xf32, #tpu.memory_space<vmem>>, %arg3: memref<2x128xf32, #tpu.memory_space<vmem>>, %arg4: memref<1xf32, #tpu.memory_space<smem>>, %arg5: memref<1x256xf32, #tpu.memory_space<vmem>>) attributes {dimension_semantics = [#tpu.dimension_semantics<parallel>], iteration_bounds = array<i64: 2>, scalar_prefetch = 0 : i64, scratch_operands = 0 : i64, tpu.core_type = #tpu.core_type<tc>, window_params = [{transform_indices = @transform_0, window_bounds = array<i64: 256, 256>}, {pipeline_mode = #tpu.pipeline_mode<synchronous>, transform_indices = @transform_1, window_bounds = array<i64: 256, 128>}, {pipeline_mode = #tpu.pipeline_mode<synchronous>, transform_indices = @transform_2, window_bounds = array<i64: 2, 128>}, {transform_indices = @transform_3, window_bounds = array<i64: 1>}, {transform_indices = @transform_4, window_bounds = array<i64: 1, 256>}]} {
    %c0 = arith.constant 0 : index
    %c0_0 = arith.constant 0 : index
    %0 = vector.load %arg1[%c0, %c0_0] : memref<256x256xf32, #tpu.memory_space<vmem>>, vector<256x256xf32>
    %c0_1 = arith.constant 0 : index
    %c0_2 = arith.constant 0 : index
    %1 = vector.load %arg2[%c0_1, %c0_2] : memref<256x128xf32, #tpu.memory_space<vmem>>, vector<256x128xf32>
    %cst = arith.constant dense<0.000000e+00> : vector<256x128xf32>
    %2 = tpu.matmul %0, %1, %cst {dimension_numbers = #tpu.dot_dimension_numbers<[1], [0], [0], [1], [0, 0, 1, 1], [], []>} : vector<256x256xf32>, vector<256x128xf32>, vector<256x128xf32> -> vector<256x128xf32>
    %c0_3 = arith.constant 0 : index
    %c0_4 = arith.constant 0 : index
    %3 = vector.load %arg3[%c0_3, %c0_4] : memref<2x128xf32, #tpu.memory_space<vmem>>, vector<2x128xf32>
    %4 = vector.extract_strided_slice %3 {offsets = [0, 0], sizes = [1, 128], strides = [1, 1]} : vector<2x128xf32> to vector<1x128xf32>
    %5 = vector.broadcast %4 : vector<1x128xf32> to vector<256x128xf32>
    %6 = arith.addf %2, %5 : vector<256x128xf32>
    %cst_5 = arith.constant 0.000000e+00 : f32
    %7 = vector.broadcast %cst_5 : f32 to vector<256x128xf32>
    %8 = arith.cmpf ogt, %6, %7 : vector<256x128xf32>
    %cst_6 = arith.constant 0.00999999977 : f32
    %9 = vector.broadcast %cst_6 : f32 to vector<256x128xf32>
    %10 = arith.mulf %9, %6 : vector<256x128xf32>
    %11 = arith.select %8, %6, %10 : vector<256x128xi1>, vector<256x128xf32>
    %12 = vector.extract_strided_slice %3 {offsets = [1, 0], sizes = [1, 128], strides = [1, 1]} : vector<2x128xf32> to vector<1x128xf32>
    %cst_7 = arith.constant dense<0.000000e+00> : vector<1x256xf32>
    %13 = tpu.matmul %12, %11, %cst_7 {dimension_numbers = #tpu.dot_dimension_numbers<[1], [1], [0], [0], [0, 0, 1, 0], [], []>} : vector<1x128xf32>, vector<256x128xf32>, vector<1x256xf32> -> vector<1x256xf32>
    %c0_8 = arith.constant 0 : index
    %14 = memref.load %arg4[%c0_8] : memref<1xf32, #tpu.memory_space<smem>>
    %15 = vector.broadcast %14 : f32 to vector<1x256xf32>
    %16 = arith.addf %13, %15 : vector<1x256xf32>
    %cst_9 = arith.constant 0.000000e+00 : f32
    %17 = vector.broadcast %cst_9 : f32 to vector<1x256xf32>
    %18 = arith.cmpf oge, %16, %17 : vector<1x256xf32>
    %cst_10 = arith.constant 0.000000e+00 : f32
    %19 = vector.broadcast %cst_10 : f32 to vector<1x256xf32>
    %20 = arith.subf %19, %16 : vector<1x256xf32>
    %21 = arith.select %18, %20, %16 : vector<1x256xi1>, vector<1x256xf32>
    %22 = math.exp %21 : vector<1x256xf32>
    %cst_11 = arith.constant 1.000000e+00 : f32
    %23 = vector.broadcast %cst_11 : f32 to vector<1x256xf32>
    %24 = arith.addf %23, %22 : vector<1x256xf32>
    %cst_12 = arith.constant 1.000000e+00 : f32
    %25 = vector.broadcast %cst_12 : f32 to vector<1x256xf32>
    %26 = arith.divf %25, %24 : vector<1x256xf32>
    %cst_13 = arith.constant 1.000000e+00 : f32
    %27 = vector.broadcast %cst_13 : f32 to vector<1x256xf32>
    %28 = arith.addf %27, %22 : vector<1x256xf32>
    %29 = arith.divf %22, %28 : vector<1x256xf32>
    %30 = arith.select %18, %26, %29 : vector<1x256xi1>, vector<1x256xf32>
    %c0_14 = arith.constant 0 : index
    %c0_15 = arith.constant 0 : index
    %31 = vector.load %arg5[%c0_14, %c0_15] : memref<1x256xf32, #tpu.memory_space<vmem>>, vector<1x256xf32>
    tpu.vector_store %arg5[%c0_14, %c0_15], %30 {strides = array<i32>} : memref<1x256xf32, #tpu.memory_space<vmem>>, vector<1x256xf32>,
    return
  }
  func.func @transform_0(%arg0: i32) -> (i32, i32) {
    %c0_i32 = arith.constant 0 : i32
    %c0_i32_0 = arith.constant 0 : i32
    return %arg0, %c0_i32 : i32, i32
  }
  func.func @transform_1(%arg0: i32) -> (i32, i32) {
    %c0_i32 = arith.constant 0 : i32
    %c0_i32_0 = arith.constant 0 : i32
    %c0_i32_1 = arith.constant 0 : i32
    return %c0_i32, %c0_i32_0 : i32, i32
  }
  func.func @transform_2(%arg0: i32) -> (i32, i32) {
    %c0_i32 = arith.constant 0 : i32
    %c0_i32_0 = arith.constant 0 : i32
    %c0_i32_1 = arith.constant 0 : i32
    return %c0_i32, %c0_i32_0 : i32, i32
  }
  func.func @transform_3(%arg0: i32) -> i32 {
    %c0_i32 = arith.constant 0 : i32
    %c0_i32_0 = arith.constant 0 : i32
    return %c0_i32 : i32
  }
  func.func @transform_4(%arg0: i32) -> (i32, i32) {
    %c0_i32 = arith.constant 0 : i32
    %c0_i32_0 = arith.constant 0 : i32
    return %c0_i32, %arg0 : i32, i32
  }
}

</mosaic_0001>

<bundles_post_ra>
// kernel: tpu_custom_call.1
= control target key start
LH: loop header
LB: loop body
LE: loop exit
PB: predicated region body
PF: predicated region fallthrough
CT: control target
= control target key end

     0   :  { %s1679_s0 = inlined_call_operand.hbm [shape: f32[300,256], index: 0, kind: input, shape index: {}]   ;;  %s1680_s1 = inlined_call_operand.hbm [shape: f32[256,128], index: 1, kind: input, shape index: {}]   ;;  %s1681_s2 = inlined_call_operand.vmem [shape: f32[2,128], index: 2, kind: input, shape index: {}]   ;;  %s1682_s3 = inlined_call_operand.<no memory space> [shape: f32[1], index: 3, kind: input, shape index: {}]   ;;  %s1683_s4 = inlined_call_operand.hbm [shape: f32[1,300], index: 4, kind: output, shape index: {}]  }
   0x1   :  { %9 = sst [smem:[#allocation2]] %s1682_s3 }
   0x2   :  { %10 = vsyncpa [#allocation4], 0 }
   0x3   :  { %12 = vsyncpa [#allocation4 + $0x1], 0 }
   0x4   :  { %13 = vsyncpa [#allocation7], 0 }
   0x5   :  { %14 = vsyncpa [#allocation5], 0 }
   0x6   :  { %16 = vsyncpa [#allocation5 + $0x1], 0  ;;  %s1263_s17 = smov 0   ;;  %s1265_s18 = smov 0  }
   0x7   :  { %s1267_s19 = smov 0   ;;  %s1269_s20 = smov 0  }
   0x8 LB: > { %s1284_s3 = sadd.s32 4294967295, %s1224_s20   ;;  %s892_s21 = sadd.s32 4294967294, %s1224_s20   ;;  %s1224_s20 = sphi %s1269_s20, %s1703_s20   ;;  %s1220_s19 = sphi %s1267_s19, %s1702_s19   ;;  %s1216_s18 = sphi %s1265_s18, %s1701_s18   ;;  %s1212_s17 = sphi %s1263_s17, %s1700_s17  }
   0x9   : > { %s1288_s22 = sadd.s32 1, %s1224_s20   ;;  %s29_s23 = sadd.s32 1, %s1220_s19 }
   0xa   : > { %s26_s24 = ssub.s32 %s1224_s20, %s1288_s22  ;;  %p36_p0 = scmp.ne.s32.totalorder %s1220_s19, %s1216_s18 }
   0xb   : > { %p27_p1 = scmp.eq.s32.totalorder %s26_s24, 0  ;;  %p37_p2 = scmp.eq.s32.totalorder %s1224_s20, 0 }
   0xc   : > { %p42_p3 = scmp.ne.s32.totalorder %s1216_s18, %s1212_s17  ;;  %p1684_p4 = scmp.eq.s32.totalorder %s1284_s3, 0 }
   0xd   : > { %s1300_s25 = scalar_select %p27_p1, %s1220_s19, %s29_s23  }
   0xe   : > { %p1302_p5 = por %p37_p2, %p36_p0  ;;  %p1308_p6 = por %p1684_p4, %p42_p3 }
   0xf   : > { %p129_p7 = scmp.eq.s32.totalorder %s1284_s3, 1  ;;  %p135_p8 = scmp.eq.s32.totalorder %s892_s21, 1 }
  0x10   : > { %s1687_s26 = scalar_select %p1302_p5, 1, 0 }
  0x11   : > { %s1688_s27 = scalar_select %p1308_p6, 1, 0 }
  0x12   : > { %p893_p9 = scmp.ge.s32.totalorder %s1224_s20, 1  ;;  %p142_p10 = scmp.lt.s32.totalorder %s1224_s20, 3 }
  0x13   : > { %p1315_p11 = por %p129_p7, %p36_p0  ;;  %p1319_p12 = por %p135_p8, %p42_p3 }
  0x14   : > { %p1323_p13 = pnand %p893_p9, %p142_p10  ;;  %s1226_s5 = smov [#allocation6]  }
  0x15   : > { %s1689_s28 = scalar_select %p1315_p11, 1, 0 }
  0x16   : > { %s1690_s29 = scalar_select %p1319_p12, 1, 0 }
  0x17   : > { %s1691_s30 = scalar_select %p1323_p13, 1, 0 }
  0x18   : > { %p1040_p1 = pneg %p1323_p13  ;;  %s154_s6 = sshll.u32 %s1226_s5, 4  ;;  %s155_s6 = int_to_ptr.vmem [resolvable:$true] %s154_s6 }
  0x19   : > { %s1098_s10 = scalar_lea.hbm %s1680_s1, 4096 }
  0x1a   : > { %p1331_p2 = pnand %p1040_p1, %p1684_p4  ;;  %p1099_p0 = scmp.ne.s32.totalorder %s1680_s1, %s1098_s10 }
  0x1b   : > { %p1105_p9 = scmp.lt.u32.totalorder %s1098_s10, %s1680_s1 }
  0x1c   : > { %p1100_p3 = pneg %p1331_p2 }
  0x1e   : > { %p1101_p7 = pnand %p1100_p3, %p1099_p0 }
  0x20   : > { %p1102_p8 = pneg %p1101_p7 }
  0x22   : > { %p1107_p10 = pnand %p1105_p9, %p1102_p8 }
  0x24   : > { %1110 = shalt.err (!%p1107_p10)
}
  0x25   : > { %s1111_s15 = scalar_lea.vmem %s155_s6, 4096  ;;  %p1119_p11 = scmp.lt.s32.totalorder %s155_s6, %s155_s6 }
  0x26   : > { %p1112_p1 = scmp.ne.s32.totalorder %s155_s6, %s1111_s15  ;;  %p1120_p6 = scmp.lt.s32.totalorder %s1111_s15, %s1111_s15 }
  0x28   : > { %p1114_p4 = pnand %p1112_p1, %p1100_p3  ;;  %p1121_p13 = por %p1120_p6, %p1119_p11 }
  0x2a   : > { %p1115_p12 = pneg %p1114_p4 }
  0x2c   : > { %p1122_p5 = pnand %p1121_p13, %p1115_p12 }
  0x2e   : > { %1125 = shalt.err (!%p1122_p5)
}
  0x2f   : > { %s1227_s16 = smov 128   ;;  %s1228_s21 = smov 8  }
  0x30   : > { %1043 = dma.hbm_to_vmem [thread:$0]  (!%p1331_p2), %s1680_s1, 4096, %s155_s6, [#allocation7], %s1227_s16, %s1227_s16, %s1228_s21  }
  0x31   : > { %p895_p0 = scmp.ge.s32.totalorder %s1224_s20, 2 }
  0x32   : > { %p1693_p4 = scmp.ne.s32.totalorder (!%p895_p0), %s1687_s26, 0 }
  0x33   : > { %170 = sbr.rel (%p895_p0) target bundleno = 93 (0x5d), region = 28 }
  0x3a   : > { %173 = sbr.rel (!%p1693_p4) target bundleno = 93 (0x5d), region = 32  ;;  %s174_s5 = sand.u32 (%p1693_p4), 1, %s1220_s19  }
  0x3b   : > { %s897_s8 = sshll.u32 (%p1693_p4), %s1224_s20, 5  ;;  %s896_s9 = sshll.u32 (%p1693_p4), %s174_s5, 9 }
  0x3c   : > { %s180_s10 = ssub.s32 (%p1693_p4), 38, %s897_s8  ;;  %s1361_s11 = scalar_lea.sflag (%p1693_p4), [#allocation4], %s174_s5 }
  0x3d   : > { %p181_p5 = scmp.lt.s32.totalorder (%p1693_p4), %s180_s10, 32  ;;  %s178_s12 = scalar_lea.vmem (%p1693_p4), [#allocation3], %s896_s9 }
  0x41   : > { %s1705_s10 = smov (!%p181_p5, %s180_s10), 32 }
  0x42   : > { %s1358_s7 = sshll.u32 %s1705_s10, 8 }
  0x43   : > { %s186_s6 = ssub.s32 8192, %s1358_s7 }
  0x44   : > { %187 = vsyncadd %s1361_s11, %s186_s6  ;;  %p900_p6 = scmp.ne.s32.totalorder %s1358_s7, 0  ;;  %s918_s26 = sshll.u32 %s1224_s20, 13 }
  0x45   : > { %s1369_s15 = scalar_lea.hbm %s1679_s0, %s918_s26  ;;  %s193_s16 = sshll.u32 %s178_s12, 4  ;;  %s1371_s16 = int_to_ptr.vmem [resolvable:$true] %s193_s16 }
  0x46   : > { %s1126_s21 = scalar_lea.hbm %s1369_s15, %s1358_s7  ;;  %s1130_s5 = scalar_lea.hbm %s1679_s0, 9728 }
  0x47   : > { %p1127_p11 = scmp.ne.s32.totalorder %s1369_s15, %s1126_s21  ;;  %p1131_p2 = scmp.lt.u32.totalorder %s1369_s15, %s1679_s0 }
  0x48   : > { %p1132_p3 = scmp.lt.u32.totalorder %s1130_s5, %s1126_s21  ;;  %p1134_p8 = scmp.lt.u32.totalorder %s1126_s21, %s1369_s15 }
  0x49   : > { %p1128_p12 = pnand %p1127_p11, %p900_p6 }
  0x4a   : > { %p1133_p7 = por %p1132_p3, %p1131_p2 }
  0x4b   : > { %p1129_p13 = pneg %p1128_p12 }
  0x4c   : > { %p1135_p9 = por %p1134_p8, %p1133_p7 }
  0x4e   : > { %p1136_p10 = pnand %p1135_p9, %p1129_p13 }
  0x50   : > { %1139 = shalt.err (!%p1136_p10)
}
  0x51   : > { %s1140_s10 = scalar_lea.vmem %s1371_s16, %s1358_s7  ;;  %s1229_s6 = smov [#allocation3]  }
  0x52   : > { %p1141_p1 = scmp.ne.s32.totalorder %s1371_s16, %s1140_s10  ;;  %s1144_s12 = sshll.u32 %s1229_s6, 4  ;;  %s1145_s12 = int_to_ptr.vmem [resolvable:$false] %s1144_s12 }
  0x53   : > { %s1146_s26 = scalar_lea.vmem %s1145_s12, 16384  ;;  %p1147_p11 = scmp.lt.s32.totalorder %s1371_s16, %s1145_s12 }
  0x54   : > { %p1142_p4 = pnand %p1141_p1, %p900_p6  ;;  %p1148_p12 = scmp.lt.s32.totalorder %s1146_s26, %s1140_s10 }
  0x56   : > { %p1143_p5 = pneg %p1142_p4  ;;  %p1149_p2 = por %p1148_p12, %p1147_p11 }
  0x58   : > { %p1150_p3 = pnand %p1149_p2, %p1143_p5 }
  0x5a   : > { %1153 = shalt.err (!%p1150_p3)
}
  0x5b   : > { %s1230_s13 = smov 256   ;;  %s1231_s14 = smov 16  }
  0x5c   : > { %199 = dma.hbm_to_vmem [thread:$0]  (%p900_p6), %s1369_s15, %s1358_s7, %s1371_s16, %s1361_s11, %s1230_s13, %s1230_s13, %s1231_s14  }
  0x5d PF: > { %p1694_p13 = scmp.ne.s32.totalorder %s1691_s30, 0 }
  0x5e   : > { %s1401_s21 = sand.u32 (!%p1694_p13), 1, %s1216_s18   ;;  %p1695_p7 = scmp.ne.s32.totalorder (!%p1694_p13), %s1688_s27, 0 }
  0x5f   : > { %205 = sbr.rel (%p1694_p13) target bundleno = 804 (0x324), region = 36  ;;  %s906_s23 = sshll.u32 (!%p1694_p13), %s1401_s21, 9 }
  0x60   : > { %s208_s24 = scalar_lea.sflag (!%p1694_p13), [#allocation4], %s1401_s21  ;;  %s1405_s5 = scalar_lea.vmem (!%p1694_p13), [#allocation3], %s906_s23 }
  0x66   : > { %1199 = dma.done.wait (%p1695_p7), %s208_s24, 8192  }
  0x67   : > { %1201 = vsyncadd (%p1695_p7), %s208_s24, 4294959104  ;;  %p1696_p6 = scmp.eq.s32.totalorder %s1284_s3, 0 }
  0x69   : > { %1203 = dma.done.wait (%p1696_p6), [#allocation7], 4096   ;;  %p1697_p8 = pmov %p1696_p6 }
  0x6a   : > { %v1232_v0 = vmov 0.0|0.0   ;;  %v315_v1 = vld [vmem:[#allocation6] sm:$0xff]  ;;  %v316_v2 = vld [vmem:[#allocation6 + $0x8] sm:$0xff]  ;;  %v317_v3 = vld [vmem:[#allocation6 + $0x10] sm:$0xff]  ;;  %s673_s7 = sld [smem:[#allocation2]]  ;;  %s908_s11 = sshll.u32 %s1401_s21, 1 }
  0x6b   : > { %1205 = vsyncadd (%p1697_p8), [#allocation7], 4294963200  ;;  %954 = vmatprep.subr.bf16.mxu0 %v1232_v0  ;;  %v955_v4 = vpack.c.bf16 %v316_v2, %v315_v1  ;;  %v318_v5 = vld [vmem:[#allocation6 + $0x18] sm:$0xff]  ;;  %v319_v7 = vld [vmem:[#allocation6 + $0x20] sm:$0xff]  ;;  %s239_s15 = scalar_lea.vmem [#allocation8], %s908_s11  ;;  %s793_s16 = scalar_lea.sflag [#allocation5], %s1401_s21 }
  0x6c   : > { %v958_v6 = vpack.c.bf16 %v318_v5, %v317_v3  ;;  %v320_v8 = vld [vmem:[#allocation6 + $0x28] sm:$0xff]  ;;  %v321_v10 = vld [vmem:[#allocation6 + $0x30] sm:$0xff]  ;;  %v322_v11 = vld [vmem:[#allocation6 + $0x38] sm:$0xff]  ;;  %p1698_p9 = scmp.ne.s32.totalorder %s1689_s28, 0 }
  0x6d   : > { %956 = vmatpush1.bf16.msra.mxu0 %v955_v4  ;;  %v961_v9 = vpack.c.bf16 %v320_v8, %v319_v7  ;;  %v252_v12 = vld [vmem:[%s1405_s5 + $0x8] sm:$0xff]  ;;  %v964_v13 = vpack.c.bf16 %v322_v11, %v321_v10  ;;  %v323_v14 = vld [vmem:[#allocation6 + $0x40] sm:$0xff]  ;;  %v325_v17 = vld [vmem:[#allocation6 + $0x50] sm:$0xff]  ;;  %s910_s8 = sshll.u32 (%p1698_p9), %s1284_s3, 1 }
  0x6e   : > { %957 = vmatprep.subr.bf16.mxu0 %v1232_v0  ;;  %416 = vmatprep.mubr.f32.mxu0 %v252_v12  ;;  %v324_v15 = vld [vmem:[#allocation6 + $0x48] sm:$0xff]  ;;  %v326_v18 = vld [vmem:[#allocation6 + $0x58] sm:$0xff]  ;;  %v327_v20 = vld [vmem:[#allocation6 + $0x60] sm:$0xff]  ;;  %s801_s9 = ssub.s32 (%p1698_p9), 3, %s910_s8 }
  0x6f   : > { %v967_v16 = vpack.c.bf16 %v324_v15, %v323_v14  ;;  %v970_v19 = vpack.c.bf16 %v326_v18, %v325_v17  ;;  %v328_v21 = vld [vmem:[#allocation6 + $0x68] sm:$0xff]  ;;  %v329_v23 = vld [vmem:[#allocation6 + $0x70] sm:$0xff]  ;;  %v330_v24 = vld [vmem:[#allocation6 + $0x78] sm:$0xff]  ;;  %p802_p10 = scmp.lt.s32.totalorder (%p1698_p9), %s801_s9, 2 }
  0x70   : > { %v973_v22 = vpack.c.bf16 %v328_v21, %v327_v20  ;;  %v976_v25 = vpack.c.bf16 %v330_v24, %v329_v23  ;;  %v331_v26 = vld [vmem:[#allocation6 + $0x80] sm:$0xff]  ;;  %v332_v27 = vld [vmem:[#allocation6 + $0x88] sm:$0xff]  ;;  %v333_v29 = vld [vmem:[#allocation6 + $0x90] sm:$0xff] }
  0x71   : > { %959 = vmatpush1.bf16.msra.mxu0 %v958_v6  ;;  %v979_v28 = vpack.c.bf16 %v332_v27, %v331_v26  ;;  %v334_v30 = vld [vmem:[#allocation6 + $0x98] sm:$0xff]  ;;  %v335_v32 = vld [vmem:[#allocation6 + $0xa0] sm:$0xff]  ;;  %v336_v33 = vld [vmem:[#allocation6 + $0xa8] sm:$0xff] }
  0x72   : > { %960 = vmatprep.subr.bf16.mxu0 %v1232_v0  ;;  %v982_v31 = vpack.c.bf16 %v334_v30, %v333_v29  ;;  %v985_v34 = vpack.c.bf16 %v336_v33, %v335_v32  ;;  %v337_v35 = vld [vmem:[#allocation6 + $0xb0] sm:$0xff]  ;;  %v338_v36 = vld [vmem:[#allocation6 + $0xb8] sm:$0xff]  ;;  %v339_v38 = vld [vmem:[#allocation6 + $0xc0] sm:$0xff] }
  0x73   : > { %v988_v37 = vpack.c.bf16 %v338_v36, %v337_v35  ;;  %v340_v39 = vld [vmem:[#allocation6 + $0xc8] sm:$0xff]  ;;  %v341_v41 = vld [vmem:[#allocation6 + $0xd0] sm:$0xff]  ;;  %v342_v42 = vld [vmem:[#allocation6 + $0xd8] sm:$0xff] }
  0x74   : > { %v991_v40 = vpack.c.bf16 %v340_v39, %v339_v38  ;;  %v994_v43 = vpack.c.bf16 %v342_v42, %v341_v41  ;;  %v343_v44 = vld [vmem:[#allocation6 + $0xe0] sm:$0xff]  ;;  %v344_v45 = vld [vmem:[#allocation6 + $0xe8] sm:$0xff]  ;;  %v345_v47 = vld [vmem:[#allocation6 + $0xf0] sm:$0xff] }
  0x75   : > { %962 = vmatpush1.bf16.msra.mxu0 %v961_v9  ;;  %v997_v46 = vpack.c.bf16 %v344_v45, %v343_v44  ;;  %v346_v48 = vld [vmem:[#allocation6 + $0xf8] sm:$0xff]  ;;  %v251_v50 = vld [vmem:[%s1405_s5] sm:$0xff]  ;;  %v253_v52 = vld [vmem:[%s1405_s5 + $0x10] sm:$0xff] }
  0x76   : > { %963 = vmatprep.subr.bf16.mxu0 %v1232_v0  ;;  %v1000_v49 = vpack.c.bf16 %v346_v48, %v345_v47  ;;  %v254_v51 = vld [vmem:[%s1405_s5 + $0x18] sm:$0xff]  ;;  %v256_v53 = vld [vmem:[%s1405_s5 + $0x28] sm:$0xff]  ;;  %v255_v54 = vld [vmem:[%s1405_s5 + $0x20] sm:$0xff] }
  0x77   : > { %v258_v55 = vld [vmem:[%s1405_s5 + $0x38] sm:$0xff]  ;;  %v257_v56 = vld [vmem:[%s1405_s5 + $0x30] sm:$0xff]  ;;  %v260_v57 = vld [vmem:[%s1405_s5 + $0x48] sm:$0xff] }
  0x78   : > { %v259_v58 = vld [vmem:[%s1405_s5 + $0x40] sm:$0xff]  ;;  %v262_v59 = vld [vmem:[%s1405_s5 + $0x58] sm:$0xff]  ;;  %v261_v60 = vld [vmem:[%s1405_s5 + $0x50] sm:$0xff] }
  0x79   : > { %965 = vmatpush1.bf16.msra.mxu0 %v964_v13  ;;  %v264_v61 = vld [vmem:[%s1405_s5 + $0x68] sm:$0xff]  ;;  %v263_v62 = vld [vmem:[%s1405_s5 + $0x60] sm:$0xff]  ;;  %v266_v63 = vld [vmem:[%s1405_s5 + $0x78] sm:$0xff] }
  0x7a   : > { %966 = vmatprep.subr.bf16.mxu0 %v1232_v0  ;;  %v268_v1 = vld [vmem:[%s1405_s5 + $0x88] sm:$0xff]  ;;  %v267_v2 = vld [vmem:[%s1405_s5 + $0x80] sm:$0xff]  ;;  %v270_v3 = vld [vmem:[%s1405_s5 + $0x98] sm:$0xff] }
  0x7b   : > { %v269_v4 = vld [vmem:[%s1405_s5 + $0x90] sm:$0xff]  ;;  %v272_v5 = vld [vmem:[%s1405_s5 + $0xa8] sm:$0xff]  ;;  %v271_v6 = vld [vmem:[%s1405_s5 + $0xa0] sm:$0xff] }
  0x7c   : > { %v274_v7 = vld [vmem:[%s1405_s5 + $0xb8] sm:$0xff]  ;;  %v273_v8 = vld [vmem:[%s1405_s5 + $0xb0] sm:$0xff]  ;;  %v276_v9 = vld [vmem:[%s1405_s5 + $0xc8] sm:$0xff] }
  0x7d   : > { %968 = vmatpush1.bf16.msra.mxu0 %v967_v16  ;;  %v275_v10 = vld [vmem:[%s1405_s5 + $0xc0] sm:$0xff]  ;;  %v278_v11 = vld [vmem:[%s1405_s5 + $0xd8] sm:$0xff]  ;;  %v277_v12 = vld [vmem:[%s1405_s5 + $0xd0] sm:$0xff] }
  0x7e   : > { %969 = vmatprep.subr.bf16.mxu0 %v1232_v0  ;;  %v280_v13 = vld [vmem:[%s1405_s5 + $0xe8] sm:$0xff]  ;;  %v279_v14 = vld [vmem:[%s1405_s5 + $0xe0] sm:$0xff]  ;;  %v282_v15 = vld [vmem:[%s1405_s5 + $0xf8] sm:$0xff] }
  0x7f   : > { %v281_v16 = vld [vmem:[%s1405_s5 + $0xf0] sm:$0xff]  ;;  %v284_v17 = vld [vmem:[%s1405_s5 + $0x108] sm:$0xff]  ;;  %v283_v18 = vld [vmem:[%s1405_s5 + $0x100] sm:$0xff] }
  0x80   : > { %v285_v20 = vld [vmem:[%s1405_s5 + $0x110] sm:$0xff]  ;;  %v288_v21 = vld [vmem:[%s1405_s5 + $0x128] sm:$0xff]  ;;  %v290_v23 = vld [vmem:[%s1405_s5 + $0x138] sm:$0xff] }
  0x81   : > { %971 = vmatpush1.bf16.msra.mxu0 %v970_v19  ;;  %v286_v19 = vld [vmem:[%s1405_s5 + $0x118] sm:$0xff]  ;;  %v289_v24 = vld [vmem:[%s1405_s5 + $0x130] sm:$0xff]  ;;  %v291_v26 = vld [vmem:[%s1405_s5 + $0x140] sm:$0xff] }
  0x82   : > { %972 = vmatprep.subr.bf16.mxu0 %v1232_v0  ;;  %v294_v27 = vld [vmem:[%s1405_s5 + $0x158] sm:$0xff]  ;;  %v296_v29 = vld [vmem:[%s1405_s5 + $0x168] sm:$0xff]  ;;  %v295_v30 = vld [vmem:[%s1405_s5 + $0x160] sm:$0xff] }
  0x83   : > { %v297_v32 = vld [vmem:[%s1405_s5 + $0x170] sm:$0xff]  ;;  %v300_v33 = vld [vmem:[%s1405_s5 + $0x188] sm:$0xff]  ;;  %v302_v35 = vld [vmem:[%s1405_s5 + $0x198] sm:$0xff] }
  0x84   : > { %v301_v36 = vld [vmem:[%s1405_s5 + $0x190] sm:$0xff]  ;;  %v303_v38 = vld [vmem:[%s1405_s5 + $0x1a0] sm:$0xff]  ;;  %v306_v39 = vld [vmem:[%s1405_s5 + $0x1b8] sm:$0xff] }
  0x85   : > { %974 = vmatpush1.bf16.msra.mxu0 %v973_v22  ;;  %v287_v22 = vld [vmem:[%s1405_s5 + $0x120] sm:$0xff]  ;;  %v308_v41 = vld [vmem:[%s1405_s5 + $0x1c8] sm:$0xff]  ;;  %v309_v44 = vld [vmem:[%s1405_s5 + $0x1d0] sm:$0xff] }
  0x86   : > { %975 = vmatprep.subr.bf16.mxu0 %v1232_v0  ;;  %v307_v42 = vld [vmem:[%s1405_s5 + $0x1c0] sm:$0xff]  ;;  %v312_v45 = vld [vmem:[%s1405_s5 + $0x1e8] sm:$0xff]  ;;  %v314_v47 = vld [vmem:[%s1405_s5 + $0x1f8] sm:$0xff] }
  0x87   : > { %v313_v48 = vld [vmem:[%s1405_s5 + $0x1f0] sm:$0xff] }
  0x89   : > { %977 = vmatpush1.bf16.msra.mxu0 %v976_v25  ;;  %v292_v25 = vld [vmem:[%s1405_s5 + $0x148] sm:$0xff] }
  0x8a   : > { %978 = vmatprep.subr.bf16.mxu0 %v1232_v0 }
  0x8d   : > { %980 = vmatpush1.bf16.msra.mxu0 %v979_v28  ;;  %v293_v28 = vld [vmem:[%s1405_s5 + $0x150] sm:$0xff] }
  0x8e   : > { %981 = vmatprep.subr.bf16.mxu0 %v1232_v0 }
  0x91   : > { %983 = vmatpush1.bf16.msra.mxu0 %v982_v31  ;;  %v298_v31 = vld [vmem:[%s1405_s5 + $0x178] sm:$0xff] }
  0x92   : > { %984 = vmatprep.subr.bf16.mxu0 %v1232_v0 }
  0x95   : > { %986 = vmatpush1.bf16.msra.mxu0 %v985_v34  ;;  %v299_v34 = vld [vmem:[%s1405_s5 + $0x180] sm:$0xff] }
  0x96   : > { %987 = vmatprep.subr.bf16.mxu0 %v1232_v0 }
  0x99   : > { %989 = vmatpush1.bf16.msra.mxu0 %v988_v37  ;;  %v304_v37 = vld [vmem:[%s1405_s5 + $0x1a8] sm:$0xff] }
  0x9a   : > { %990 = vmatprep.subr.bf16.mxu0 %v1232_v0 }
  0x9d   : > { %992 = vmatpush1.bf16.msra.mxu0 %v991_v40  ;;  %v305_v40 = vld [vmem:[%s1405_s5 + $0x1b0] sm:$0xff] }
  0x9e   : > { %993 = vmatprep.subr.bf16.mxu0 %v1232_v0 }
  0xa1   : > { %995 = vmatpush1.bf16.msra.mxu0 %v994_v43  ;;  %v310_v43 = vld [vmem:[%s1405_s5 + $0x1d8] sm:$0xff] }
  0xa2   : > { %996 = vmatprep.subr.bf16.mxu0 %v1232_v0 }
  0xa5   : > { %998 = vmatpush1.bf16.msra.mxu0 %v997_v46  ;;  %v311_v46 = vld [vmem:[%s1405_s5 + $0x1e0] sm:$0xff] }
  0xa6   : > { %999 = vmatprep.subr.bf16.mxu0 %v1232_v0  ;;  %v265_v0 = vld [vmem:[%s1405_s5 + $0x70] sm:$0xff] }
  0xa9   : > { %1001 = vmatpush1.bf16.msra.mxu0 %v1000_v49  ;;  %v348_v49 = vlaneseq }
  0xac   : > { %417 = vmatmul.mubr.f32.vlgmr.msra.gmra.mrb[0].mxu0 %v251_v50  ;;  %v1496_v50 = vshrl.u32 %v348_v49, 7 }
  0xad   : > { %421 = vmatprep.mubr.f32.mxu0 %v254_v51 }
  0xae   : > { %v350_v51 = vsub.s32 0, %v1496_v50 }
  0xb0   : > { %422 = vmatmul.mubr.f32.gmra.mrb[2].mxu0 %v253_v52  ;;  %v1502_v52 = vld [vmem:[%s1681_s2] sm:$0x3] }
  0xb1   : > { %426 = vmatprep.mubr.f32.mxu0 %v256_v53  ;;  %v1505_v53 = vrot.slane %v1502_v52, %v350_v51 }
  0xb4   : > { %427 = vmatmul.mubr.f32.gmra.mrb[4].mxu0 %v255_v54 }
  0xb5   : > { %431 = vmatprep.mubr.f32.mxu0 %v258_v55 }
  0xb8   : > { %432 = vmatmul.mubr.f32.gmra.mrb[6].mxu0 %v257_v56 }
  0xb9   : > { %436 = vmatprep.mubr.f32.mxu0 %v260_v57 }
  0xbc   : > { %437 = vmatmul.mubr.f32.gmra.mrb[8].mxu0 %v259_v58 }
  0xbd   : > { %441 = vmatprep.mubr.f32.mxu0 %v262_v59 }
  0xc0   : > { %442 = vmatmul.mubr.f32.gmra.mrb[10].mxu0 %v261_v60 }
  0xc1   : > { %446 = vmatprep.mubr.f32.mxu0 %v264_v61  ;;  %v676_v61 = vrot.slane %v1502_v52, 1 }
  0xc3   : > { %952 = vmatprep.mubr.f32.mxu1 %v676_v61 }
  0xc4   : > { %447 = vmatmul.mubr.f32.gmra.mrb[12].mxu0 %v263_v62 }
  0xc5   : > { %451 = vmatprep.mubr.f32.mxu0 %v266_v63 }
  0xc8   : > { %452 = vmatmul.mubr.f32.gmra.mrb[14].mxu0 %v265_v0 }
  0xc9   : > { %456 = vmatprep.mubr.f32.mxu0 %v268_v1 }
  0xcc   : > { %457 = vmatmul.mubr.f32.gmra.mrb[16].mxu0 %v267_v2 }
  0xcd   : > { %461 = vmatprep.mubr.f32.mxu0 %v270_v3 }
  0xd0   : > { %462 = vmatmul.mubr.f32.gmra.mrb[18].mxu0 %v269_v4 }
  0xd1   : > { %466 = vmatprep.mubr.f32.mxu0 %v272_v5 }
  0xd4   : > { %467 = vmatmul.mubr.f32.gmra.mrb[20].mxu0 %v271_v6 }
  0xd5   : > { %471 = vmatprep.mubr.f32.mxu0 %v274_v7 }
  0xd8   : > { %472 = vmatmul.mubr.f32.gmra.mrb[22].mxu0 %v273_v8 }
  0xd9   : > { %476 = vmatprep.mubr.f32.mxu0 %v276_v9 }
  0xdc   : > { %477 = vmatmul.mubr.f32.gmra.mrb[24].mxu0 %v275_v10 }
  0xdd   : > { %481 = vmatprep.mubr.f32.mxu0 %v278_v11 }
  0xe0   : > { %482 = vmatmul.mubr.f32.gmra.mrb[26].mxu0 %v277_v12 }
  0xe1   : > { %486 = vmatprep.mubr.f32.mxu0 %v280_v13 }
  0xe4   : > { %487 = vmatmul.mubr.f32.gmra.mrb[28].mxu0 %v279_v14 }
  0xe5   : > { %491 = vmatprep.mubr.f32.mxu0 %v282_v15 }
  0xe8   : > { %492 = vmatmul.mubr.f32.gmra.mrb[30].mxu0 %v281_v16 }
  0xe9   : > { %496 = vmatprep.mubr.f32.mxu0 %v284_v17 }
  0xec   : > { %497 = vmatmul.mubr.f32.gmra.mrb[32].mxu0 %v283_v18 }
  0xed   : > { %501 = vmatprep.mubr.f32.mxu0 %v286_v19 }
  0xf0   : > { %502 = vmatmul.mubr.f32.gmra.mrb[34].mxu0 %v285_v20 }
  0xf1   : > { %506 = vmatprep.mubr.f32.mxu0 %v288_v21 }
  0xf4   : > { %507 = vmatmul.mubr.f32.gmra.mrb[36].mxu0 %v287_v22 }
  0xf5   : > { %511 = vmatprep.mubr.f32.mxu0 %v290_v23 }
  0xf8   : > { %512 = vmatmul.mubr.f32.gmra.mrb[38].mxu0 %v289_v24 }
  0xf9   : > { %516 = vmatprep.mubr.f32.mxu0 %v292_v25 }
  0xfc   : > { %517 = vmatmul.mubr.f32.gmra.mrb[40].mxu0 %v291_v26 }
  0xfd   : > { %521 = vmatprep.mubr.f32.mxu0 %v294_v27 }
 0x100   : > { %522 = vmatmul.mubr.f32.gmra.mrb[42].mxu0 %v293_v28 }
 0x101   : > { %526 = vmatprep.mubr.f32.mxu0 %v296_v29 }
 0x104   : > { %527 = vmatmul.mubr.f32.gmra.mrb[44].mxu0 %v295_v30 }
 0x105   : > { %531 = vmatprep.mubr.f32.mxu0 %v298_v31 }
 0x108   : > { %532 = vmatmul.mubr.f32.gmra.mrb[46].mxu0 %v297_v32 }
 0x109   : > { %536 = vmatprep.mubr.f32.mxu0 %v300_v33 }
 0x10c   : > { %537 = vmatmul.mubr.f32.gmra.mrb[48].mxu0 %v299_v34 }
 0x10d   : > { %541 = vmatprep.mubr.f32.mxu0 %v302_v35 }
 0x110   : > { %542 = vmatmul.mubr.f32.gmra.mrb[50].mxu0 %v301_v36 }
 0x111   : > { %546 = vmatprep.mubr.f32.mxu0 %v304_v37 }
 0x114   : > { %547 = vmatmul.mubr.f32.gmra.mrb[52].mxu0 %v303_v38 }
 0x115   : > { %551 = vmatprep.mubr.f32.mxu0 %v306_v39 }
 0x118   : > { %552 = vmatmul.mubr.f32.gmra.mrb[54].mxu0 %v305_v40 }
 0x119   : > { %556 = vmatprep.mubr.f32.mxu0 %v308_v41 }
 0x11c   : > { %557 = vmatmul.mubr.f32.gmra.mrb[56].mxu0 %v307_v42 }
 0x11d   : > { %561 = vmatprep.mubr.f32.mxu0 %v310_v43 }
 0x120   : > { %562 = vmatmul.mubr.f32.gmra.mrb[58].mxu0 %v309_v44 }
 0x121   : > { %566 = vmatprep.mubr.f32.mxu0 %v312_v45 }
 0x124   : > { %567 = vmatmul.mubr.f32.gmra.mrb[60].mxu0 %v311_v46 }
 0x125   : > { %571 = vmatprep.mubr.f32.mxu0 %v314_v47 }
 0x128   : > { %572 = vmatmul.mubr.f32.gmra.mrb[62].mxu0 %v313_v48 }
 0x17f   : > { %v418_v54 = vpop.f32.mrb[0].mxu0 }
 0x180   : > { %v419_v55 = vadd.f32 %v418_v54, %v1505_v53  ;;  %v420_v56 = vpop.f32.mrb[1].mxu0 }
 0x182   : > { %v609_v58 = vmul.f32 0.01, %v419_v55  ;;  %vm577_vm0 = vcmp.gt.f32.partialorder %v419_v55, 0.0 }
 0x183   : > { %v423_v57 = vpop.f32.mrb[2].mxu0 }
 0x184   : > { %v424_v59 = vadd.f32 %v423_v57, %v1505_v53  ;;  %v425_v60 = vpop.f32.mrb[3].mxu0  ;;  %v1513_v2 = vsel %vm577_vm0, %v419_v55, %v609_v58 }
 0x186   : > { %v610_v62 = vmul.f32 0.01, %v424_v59  ;;  %vm578_vm1 = vcmp.gt.f32.partialorder %v424_v59, 0.0 }
 0x187   : > { %v428_v63 = vpop.f32.mrb[4].mxu0 }
 0x188   : > { %v429_v0 = vadd.f32 %v428_v63, %v1505_v53  ;;  %v430_v1 = vpop.f32.mrb[5].mxu0  ;;  %v1515_v3 = vsel %vm578_vm1, %v424_v59, %v610_v62 }
 0x189   : > { %v1004_v4 = vpack.c.bf16 %v1515_v3, %v1513_v2 }
 0x18a   : > { %v611_v6 = vmul.f32 0.01, %v429_v0  ;;  %vm579_vm2 = vcmp.gt.f32.partialorder %v429_v0, 0.0 }
 0x18b   : > { %v433_v5 = vpop.f32.mrb[6].mxu0 }
 0x18c   : > { %v434_v7 = vadd.f32 %v433_v5, %v1505_v53  ;;  %v435_v8 = vpop.f32.mrb[7].mxu0  ;;  %v1521_v13 = vsel %vm579_vm2, %v429_v0, %v611_v6 }
 0x18e   : > { %vm580_vm3 = vcmp.gt.f32.partialorder %v434_v7, 0.0  ;;  %v612_v9 = vmul.f32 0.01, %v434_v7 }
 0x18f   : > { %v438_v10 = vpop.f32.mrb[8].mxu0 }
 0x190   : > { %v439_v11 = vadd.f32 %v438_v10, %v1505_v53  ;;  %v440_v12 = vpop.f32.mrb[9].mxu0  ;;  %v1523_v14 = vsel %vm580_vm3, %v434_v7, %v612_v9 }
 0x191   : > { %v1008_v15 = vpack.c.bf16 %v1523_v14, %v1521_v13 }
 0x192   : > { %v613_v17 = vmul.f32 0.01, %v439_v11  ;;  %vm581_vm4 = vcmp.gt.f32.partialorder %v439_v11, 0.0 }
 0x193   : > { %v443_v16 = vpop.f32.mrb[10].mxu0 }
 0x194   : > { %v444_v18 = vadd.f32 %v443_v16, %v1505_v53  ;;  %v445_v19 = vpop.f32.mrb[11].mxu0  ;;  %v1529_v24 = vsel %vm581_vm4, %v439_v11, %v613_v17 }
 0x196   : > { %vm582_vm5 = vcmp.gt.f32.partialorder %v444_v18, 0.0  ;;  %v614_v20 = vmul.f32 0.01, %v444_v18 }
 0x197   : > { %v448_v21 = vpop.f32.mrb[12].mxu0 }
 0x198   : > { %v449_v22 = vadd.f32 %v448_v21, %v1505_v53  ;;  %v450_v23 = vpop.f32.mrb[13].mxu0  ;;  %v1531_v25 = vsel %vm582_vm5, %v444_v18, %v614_v20 }
 0x199   : > { %v1012_v26 = vpack.c.bf16 %v1531_v25, %v1529_v24 }
 0x19a   : > { %v615_v28 = vmul.f32 0.01, %v449_v22  ;;  %vm583_vm6 = vcmp.gt.f32.partialorder %v449_v22, 0.0 }
 0x19b   : > { %v453_v27 = vpop.f32.mrb[14].mxu0 }
 0x19c   : > { %v454_v29 = vadd.f32 %v453_v27, %v1505_v53  ;;  %v455_v30 = vpop.f32.mrb[15].mxu0  ;;  %v1537_v35 = vsel %vm583_vm6, %v449_v22, %v615_v28 }
 0x19e   : > { %vm584_vm7 = vcmp.gt.f32.partialorder %v454_v29, 0.0  ;;  %v616_v31 = vmul.f32 0.01, %v454_v29 }
 0x19f   : > { %v458_v32 = vpop.f32.mrb[16].mxu0 }
 0x1a0   : > { %v459_v33 = vadd.f32 %v458_v32, %v1505_v53  ;;  %v460_v34 = vpop.f32.mrb[17].mxu0  ;;  %v1539_v36 = vsel %vm584_vm7, %v454_v29, %v616_v31 }
 0x1a1   : > { %v1016_v37 = vpack.c.bf16 %v1539_v36, %v1537_v35 }
 0x1a2   : > { %v617_v39 = vmul.f32 0.01, %v459_v33  ;;  %vm585_vm8 = vcmp.gt.f32.partialorder %v459_v33, 0.0 }
 0x1a3   : > { %v463_v38 = vpop.f32.mrb[18].mxu0 }
 0x1a4   : > { %v464_v40 = vadd.f32 %v463_v38, %v1505_v53  ;;  %v465_v41 = vpop.f32.mrb[19].mxu0  ;;  %v1545_v46 = vsel %vm585_vm8, %v459_v33, %v617_v39 }
 0x1a6   : > { %vm586_vm9 = vcmp.gt.f32.partialorder %v464_v40, 0.0  ;;  %v618_v42 = vmul.f32 0.01, %v464_v40 }
 0x1a7   : > { %v468_v43 = vpop.f32.mrb[20].mxu0 }
 0x1a8   : > { %v469_v44 = vadd.f32 %v468_v43, %v1505_v53  ;;  %v470_v45 = vpop.f32.mrb[21].mxu0  ;;  %v1547_v47 = vsel %vm586_vm9, %v464_v40, %v618_v42 }
 0x1a9   : > { %v1020_v48 = vpack.c.bf16 %v1547_v47, %v1545_v46 }
 0x1aa   : > { %v619_v54 = vmul.f32 0.01, %v469_v44  ;;  %vm587_vm10 = vcmp.gt.f32.partialorder %v469_v44, 0.0 }
 0x1ab   : > { %v473_v51 = vpop.f32.mrb[22].mxu0 }
 0x1ac   : > { %v474_v55 = vadd.f32 %v473_v51, %v1505_v53  ;;  %v475_v56 = vpop.f32.mrb[23].mxu0  ;;  %v1553_v62 = vsel %vm587_vm10, %v469_v44, %v619_v54 }
 0x1ae   : > { %vm588_vm11 = vcmp.gt.f32.partialorder %v474_v55, 0.0  ;;  %v620_v57 = vmul.f32 0.01, %v474_v55 }
 0x1af   : > { %v478_v58 = vpop.f32.mrb[24].mxu0 }
 0x1b0   : > { %v479_v59 = vadd.f32 %v478_v58, %v1505_v53  ;;  %v480_v60 = vpop.f32.mrb[25].mxu0  ;;  %v1555_v63 = vsel %vm588_vm11, %v474_v55, %v620_v57 }
 0x1b1   : > { %v1024_v0 = vpack.c.bf16 %v1555_v63, %v1553_v62 }
 0x1b2   : > { %v621_v5 = vmul.f32 0.01, %v479_v59  ;;  %vm589_vm12 = vcmp.gt.f32.partialorder %v479_v59, 0.0 }
 0x1b3   : > { %v483_v1 = vpop.f32.mrb[26].mxu0 }
 0x1b4   : > { %v484_v6 = vadd.f32 %v483_v1, %v1505_v53  ;;  %v485_v7 = vpop.f32.mrb[27].mxu0  ;;  %v1561_v12 = vsel %vm589_vm12, %v479_v59, %v621_v5 }
 0x1b6   : > { %vm590_vm13 = vcmp.gt.f32.partialorder %v484_v6, 0.0  ;;  %v622_v8 = vmul.f32 0.01, %v484_v6 }
 0x1b7   : > { %v488_v9 = vpop.f32.mrb[28].mxu0 }
 0x1b8   : > { %v489_v10 = vadd.f32 %v488_v9, %v1505_v53  ;;  %v490_v11 = vpop.f32.mrb[29].mxu0  ;;  %v1563_v16 = vsel %vm590_vm13, %v484_v6, %v622_v8 }
 0x1b9   : > { %v1028_v17 = vpack.c.bf16 %v1563_v16, %v1561_v12 }
 0x1ba   : > { %v623_v19 = vmul.f32 0.01, %v489_v10  ;;  %vm591_vm14 = vcmp.gt.f32.partialorder %v489_v10, 0.0 }
 0x1bb   : > { %v493_v18 = vpop.f32.mrb[30].mxu0 }
 0x1bc   : > { %v494_v20 = vadd.f32 %v493_v18, %v1505_v53  ;;  %v495_v21 = vpop.f32.mrb[31].mxu0  ;;  %v1569_v29 = vsel %vm591_vm14, %v489_v10, %v623_v19 }
 0x1be   : > { %vm592_vm15 = vcmp.gt.f32.partialorder %v494_v20, 0.0  ;;  %v624_v22 = vmul.f32 0.01, %v494_v20 }
 0x1bf   : > { %v498_v23 = vpop.f32.mrb[32].mxu0 }
 0x1c0   : > { %v499_v27 = vadd.f32 %v498_v23, %v1505_v53  ;;  %v500_v28 = vpop.f32.mrb[33].mxu0  ;;  %v1571_v30 = vsel %vm592_vm15, %v494_v20, %v624_v22 }
 0x1c1   : > { %v1032_v31 = vpack.c.bf16 %v1571_v30, %v1569_v29 }
 0x1c2   : > { %v625_v33 = vmul.f32 0.01, %v499_v27  ;;  %vm593_vm0 = vcmp.gt.f32.partialorder %v499_v27, 0.0 }
 0x1c3   : > { %v503_v32 = vpop.f32.mrb[34].mxu0 }
 0x1c4   : > { %v504_v34 = vadd.f32 %v503_v32, %v1505_v53  ;;  %v505_v38 = vpop.f32.mrb[35].mxu0  ;;  %v657_v43 = vsel %vm593_vm0, %v499_v27, %v625_v33 }
 0x1c6   : > { %v626_v39 = vmul.f32 0.01, %v504_v34  ;;  %vm594_vm1 = vcmp.gt.f32.partialorder %v504_v34, 0.0 }
 0x1c7   : > { %v508_v40 = vpop.f32.mrb[36].mxu0 }
 0x1c8   : > { %v509_v41 = vadd.f32 %v508_v40, %v1505_v53  ;;  %v510_v42 = vpop.f32.mrb[37].mxu0  ;;  %v658_v44 = vsel %vm594_vm1, %v504_v34, %v626_v39 }
 0x1c9   : > { %v1002_v45 = vpack.c.bf16 %v658_v44, %v657_v43 }
 0x1ca   : > { %v627_v54 = vmul.f32 0.01, %v509_v41  ;;  %vm595_vm2 = vcmp.gt.f32.partialorder %v509_v41, 0.0 }
 0x1cb   : > { %v513_v51 = vpop.f32.mrb[38].mxu0  ;;  %1003 = vmatprep.subr.bf16.mxu1 %v1002_v45 }
 0x1cc   : > { %v514_v55 = vadd.f32 %v513_v51, %v1505_v53  ;;  %v515_v56 = vpop.f32.mrb[39].mxu0  ;;  %1005 = vmatpush3.bf16.xpose.msra.mxu1 %v1004_v4  ;;  %v659_v1 = vsel %vm595_vm2, %v509_v41, %v627_v54  ;;  %vm789_vm2 = vcmp.lt.s32.totalorder %v348_v49, 256 }
 0x1ce   : > { %vm596_vm3 = vcmp.gt.f32.partialorder %v514_v55, 0.0  ;;  %v628_v57 = vmul.f32 0.01, %v514_v55 }
 0x1cf   : > { %v518_v58 = vpop.f32.mrb[40].mxu0 }
 0x1d0   : > { %v519_v59 = vadd.f32 %v518_v58, %v1505_v53  ;;  %v520_v60 = vpop.f32.mrb[41].mxu0  ;;  %v660_v5 = vsel %vm596_vm3, %v514_v55, %v628_v57 }
 0x1d1   : > { %v1006_v6 = vpack.c.bf16 %v660_v5, %v659_v1 }
 0x1d2   : > { %v629_v8 = vmul.f32 0.01, %v519_v59  ;;  %vm597_vm4 = vcmp.gt.f32.partialorder %v519_v59, 0.0 }
 0x1d3   : > { %v523_v7 = vpop.f32.mrb[42].mxu0  ;;  %1007 = vmatprep.subr.bf16.mxu1 %v1006_v6 }
 0x1d4   : > { %v524_v9 = vadd.f32 %v523_v7, %v1505_v53  ;;  %v525_v10 = vpop.f32.mrb[43].mxu0  ;;  %1009 = vmatpush3.bf16.xpose.msra.mxu1 %v1008_v15  ;;  %v661_v18 = vsel %vm597_vm4, %v519_v59, %v629_v8 }
 0x1d6   : > { %vm598_vm5 = vcmp.gt.f32.partialorder %v524_v9, 0.0  ;;  %v630_v2 = vmul.f32 0.01, %v524_v9 }
 0x1d7   : > { %v528_v3 = vpop.f32.mrb[44].mxu0 }
 0x1d8   : > { %v529_v4 = vadd.f32 %v528_v3, %v1505_v53  ;;  %v530_v11 = vpop.f32.mrb[45].mxu0  ;;  %v662_v19 = vsel %vm598_vm5, %v524_v9, %v630_v2 }
 0x1d9   : > { %v1010_v20 = vpack.c.bf16 %v662_v19, %v661_v18 }
 0x1da   : > { %v631_v22 = vmul.f32 0.01, %v529_v4  ;;  %vm599_vm6 = vcmp.gt.f32.partialorder %v529_v4, 0.0 }
 0x1db   : > { %v533_v21 = vpop.f32.mrb[46].mxu0  ;;  %1011 = vmatprep.subr.bf16.mxu1 %v1010_v20 }
 0x1dc   : > { %v534_v23 = vadd.f32 %v533_v21, %v1505_v53  ;;  %v535_v27 = vpop.f32.mrb[47].mxu0  ;;  %1013 = vmatpush3.bf16.xpose.msra.mxu1 %v1012_v26  ;;  %v663_v32 = vsel %vm599_vm6, %v529_v4, %v631_v22 }
 0x1de   : > { %vm600_vm7 = vcmp.gt.f32.partialorder %v534_v23, 0.0  ;;  %v632_v13 = vmul.f32 0.01, %v534_v23 }
 0x1df   : > { %v538_v14 = vpop.f32.mrb[48].mxu0 }
 0x1e0   : > { %v539_v15 = vadd.f32 %v538_v14, %v1505_v53  ;;  %v540_v28 = vpop.f32.mrb[49].mxu0  ;;  %v664_v33 = vsel %vm600_vm7, %v534_v23, %v632_v13  ;;  %v1233_v14 = vmov 1966171168  }
 0x1e1   : > { %v1014_v34 = vpack.c.bf16 %v664_v33, %v663_v32 }
 0x1e2   : > { %v633_v39 = vmul.f32 0.01, %v539_v15  ;;  %vm601_vm8 = vcmp.gt.f32.partialorder %v539_v15, 0.0 }
 0x1e3   : > { %v543_v38 = vpop.f32.mrb[50].mxu0  ;;  %1015 = vmatprep.subr.bf16.mxu1 %v1014_v34 }
 0x1e4   : > { %v544_v40 = vadd.f32 %v543_v38, %v1505_v53  ;;  %v545_v41 = vpop.f32.mrb[51].mxu0  ;;  %1017 = vmatpush3.bf16.xpose.msra.mxu1 %v1016_v37  ;;  %v665_v43 = vsel %vm601_vm8, %v539_v15, %v633_v39  ;;  %v773_v15 = vunpack.c.l.s4 %v1233_v14 }
 0x1e6   : > { %vm602_vm9 = vcmp.gt.f32.partialorder %v544_v40, 0.0  ;;  %v634_v24 = vmul.f32 0.01, %v544_v40  ;;  %v774_v28 = vunpack.c.0.s8 %v773_v15 }
 0x1e7   : > { %v548_v25 = vpop.f32.mrb[52].mxu0 }
 0x1e8   : > { %v549_v26 = vadd.f32 %v548_v25, %v1505_v53  ;;  %v550_v42 = vpop.f32.mrb[53].mxu0  ;;  %v666_v44 = vsel %vm602_vm9, %v544_v40, %v634_v24  ;;  %v777_v40 = vsub.s32 %v774_v28, %v1496_v50 }
 0x1e9   : > { %v1018_v45 = vpack.c.bf16 %v666_v44, %v665_v43 }
 0x1ea   : > { %v635_v54 = vmul.f32 0.01, %v549_v26  ;;  %vm603_vm10 = vcmp.gt.f32.partialorder %v549_v26, 0.0 }
 0x1eb   : > { %v553_v51 = vpop.f32.mrb[54].mxu0  ;;  %1019 = vmatprep.subr.bf16.mxu1 %v1018_v45 }
 0x1ec   : > { %v554_v55 = vadd.f32 %v553_v51, %v1505_v53  ;;  %v555_v56 = vpop.f32.mrb[55].mxu0  ;;  %1021 = vmatpush3.bf16.xpose.msra.mxu1 %v1020_v48  ;;  %v667_v58 = vsel %vm603_vm10, %v549_v26, %v635_v54 }
 0x1ee   : > { %vm604_vm11 = vcmp.gt.f32.partialorder %v554_v55, 0.0  ;;  %v636_v35 = vmul.f32 0.01, %v554_v55 }
 0x1ef   : > { %v558_v36 = vpop.f32.mrb[56].mxu0 }
 0x1f0   : > { %v559_v37 = vadd.f32 %v558_v36, %v1505_v53  ;;  %v560_v57 = vpop.f32.mrb[57].mxu0  ;;  %v668_v59 = vsel %vm604_vm11, %v554_v55, %v636_v35 }
 0x1f1   : > { %v1022_v60 = vpack.c.bf16 %v668_v59, %v667_v58 }
 0x1f2   : > { %v637_v5 = vmul.f32 0.01, %v559_v37  ;;  %vm605_vm12 = vcmp.gt.f32.partialorder %v559_v37, 0.0 }
 0x1f3   : > { %v563_v1 = vpop.f32.mrb[58].mxu0  ;;  %1023 = vmatprep.subr.bf16.mxu1 %v1022_v60 }
 0x1f4   : > { %v564_v6 = vadd.f32 %v563_v1, %v1505_v53  ;;  %v565_v7 = vpop.f32.mrb[59].mxu0  ;;  %1025 = vmatpush3.bf16.xpose.msra.mxu1 %v1024_v0  ;;  %v669_v9 = vsel %vm605_vm12, %v559_v37, %v637_v5 }
 0x1f6   : > { %vm606_vm13 = vcmp.gt.f32.partialorder %v564_v6, 0.0  ;;  %v638_v46 = vmul.f32 0.01, %v564_v6 }
 0x1f7   : > { %v568_v47 = vpop.f32.mrb[60].mxu0 }
 0x1f8   : > { %v569_v48 = vadd.f32 %v568_v47, %v1505_v53  ;;  %v570_v8 = vpop.f32.mrb[61].mxu0  ;;  %v670_v10 = vsel %vm606_vm13, %v564_v6, %v638_v46 }
 0x1f9   : > { %v1026_v2 = vpack.c.bf16 %v670_v10, %v669_v9 }
 0x1fa   : > { %v639_v4 = vmul.f32 0.01, %v569_v48  ;;  %vm607_vm14 = vcmp.gt.f32.partialorder %v569_v48, 0.0 }
 0x1fb   : > { %v573_v3 = vpop.f32.mrb[62].mxu0  ;;  %1027 = vmatprep.subr.bf16.mxu1 %v1026_v2 }
 0x1fc   : > { %v574_v11 = vadd.f32 %v573_v3, %v1505_v53  ;;  %v575_v18 = vpop.f32.mrb[63].mxu0  ;;  %1029 = vmatpush3.bf16.xpose.msra.mxu1 %v1028_v17  ;;  %v671_v63 = vsel %vm607_vm14, %v569_v48, %v639_v4  ;;  %v674_v53 = vstv %s673_s7 }
 0x1fe   : > { %vm608_vm15 = vcmp.gt.f32.partialorder %v574_v11, 0.0  ;;  %v640_v62 = vmul.f32 0.01, %v574_v11 }
 0x200   : > { %v672_v0 = vsel %vm608_vm15, %v574_v11, %v640_v62 }
 0x201   : > { %v1030_v19 = vpack.c.bf16 %v672_v0, %v671_v63 }
 0x203   : > { %1031 = vmatprep.subr.bf16.mxu1 %v1030_v19 }
 0x204   : > { %1033 = vmatpush3.bf16.xpose.msra.mxu1 %v1032_v31 }
 0x20b   : > { %953 = vmatmul.mubr.f32.vlgmr.msra.gmra.mrb[0].mxu1 %v676_v61 }
 0x2de   : > { %v744_v20 = vpop.f32.mrb[0].mxu1 }
 0x2df   : > { %v745_v21 = vadd.f32 %v744_v20, %v674_v53  ;;  %v746_v12 = vpop.f32.mrb[1].mxu1 }
 0x2e0   : > { %v747_v16 = vadd.f32 %v746_v12, %v674_v53 }
 0x2e1   : > { %vm749_vm0 = vcmp.ge.f32.partialorder %v745_v21, 0.0  ;;  %v751_v17 = vsub.f32 0.0, %v745_v21 }
 0x2e2   : > { %vm750_vm1 = vcmp.ge.f32.partialorder %v747_v16, 0.0  ;;  %v752_v22 = vsub.f32 0.0, %v747_v16 }
 0x2e3   : > { %v753_v23 = vsel %vm749_vm0, %v751_v17, %v745_v21 }
 0x2e4   : > { %v755_v27 = vmul.f32 1.442695, %v753_v23  ;;  %v754_v13 = vsel %vm750_vm1, %v752_v22, %v747_v16 }
 0x2e5   : > { %v757_v29 = vmul.f32 1.442695, %v754_v13 }
 0x2e6   : > { %1090 = vpow2.f32 %v755_v27 }
 0x2e7   : > { %1092 = vpow2.f32 %v757_v29 }
 0x2f0   : > { %v1091_v52 = vpop.eup %1090 }
 0x2f1   : > { %v1093_v61 = vpop.eup %1092  ;;  %v759_v30 = vadd.f32 1.0, %v1091_v52 }
 0x2f2   : > { %v760_v31 = vadd.f32 1.0, %v1093_v61 }
 0x2f3   : > { %1094 = vrcp.f32 %v759_v30 }
 0x2f4   : > { %1096 = vrcp.f32 %v760_v31 }
 0x2fd   : > { %v1095_v32 = vpop.eup %1094 }
 0x2fe   : > { %v1097_v33 = vpop.eup %1096  ;;  %v765_v34 = vmul.f32 %v1095_v32, %v1091_v52 }
 0x2ff   : > { %v766_v38 = vmul.f32 %v1097_v33, %v1093_v61 }
 0x300   : > { %v767_v39 = vsel %vm749_vm0, %v1095_v32, %v765_v34 }
 0x301   : > { %v768_v41 = vsel %vm750_vm1, %v1097_v33, %v766_v38 }
 0x302   : > { %v771_v24 = vcombine.low %v767_v39, %v768_v41  ;;  %799 = sbr.rel (!%p1698_p9) target bundleno = 804 (0x324), region = 48 }
 0x304   : > { %v778_v25 = vrot.slane %v771_v24, %v777_v40 }
 0x306   : > { %v785_v26 = vrot.slane %v778_v25, %v777_v40 }
 0x308   : > { %791 = vst.msk [vmem:[%s239_s15] sm:$0x3] %vm789_vm2, %v785_v26 }
 0x309   : > { %s1707_s9 = smov (!%p802_p10, %s801_s9), 2 }
 0x30a   : > { %s1627_s10 = sshll.u32 %s1707_s9, 4 }
 0x30b   : > { %s806_s6 = ssub.s32 32, %s1627_s10 }
 0x30c   : > { %807 = vsyncadd %s793_s16, %s806_s6  ;;  %p912_p1 = scmp.ne.s32.totalorder %s1627_s10, 0  ;;  %s919_s12 = sshll.u32 %s1284_s3, 5 }
 0x30d   : > { %s1637_s13 = scalar_lea.hbm %s1683_s4, %s919_s12  ;;  %s812_s14 = sshll.u32 %s239_s15, 4  ;;  %s813_s14 = int_to_ptr.vmem [resolvable:$true] %s812_s14 }
 0x30e   : > { %s1154_s23 = scalar_lea.vmem %s813_s14, %s1627_s10  ;;  %s1234_s24 = smov [#allocation8]  }
 0x30f   : > { %p1155_p4 = scmp.ne.s32.totalorder %s813_s14, %s1154_s23  ;;  %s1158_s5 = sshll.u32 %s1234_s24, 4  ;;  %s1159_s5 = int_to_ptr.vmem [resolvable:$false] %s1158_s5 }
 0x310   : > { %s1160_s27 = scalar_lea.vmem %s1159_s5, 64  ;;  %p1161_p12 = scmp.lt.s32.totalorder %s813_s14, %s1159_s5 }
 0x311   : > { %p1156_p5 = pnand %p1155_p4, %p912_p1  ;;  %p1162_p2 = scmp.lt.s32.totalorder %s1160_s27, %s1154_s23 }
 0x313   : > { %p1157_p11 = pneg %p1156_p5  ;;  %p1163_p3 = por %p1162_p2, %p1161_p12 }
 0x315   : > { %p1164_p13 = pnand %p1163_p3, %p1157_p11 }
 0x317   : > { %1167 = shalt.err (!%p1164_p13)
}
 0x318   : > { %s1168_s3 = scalar_lea.hbm %s1637_s13, %s1627_s10  ;;  %s1172_s11 = scalar_lea.hbm %s1683_s4, 48 }
 0x319   : > { %p1169_p7 = scmp.ne.s32.totalorder %s1637_s13, %s1168_s3  ;;  %p1173_p9 = scmp.lt.u32.totalorder %s1637_s13, %s1683_s4 }
 0x31a   : > { %p1174_p10 = scmp.lt.u32.totalorder %s1172_s11, %s1168_s3  ;;  %p1176_p5 = scmp.lt.u32.totalorder %s1168_s3, %s1637_s13 }
 0x31b   : > { %p1170_p6 = pnand %p1169_p7, %p912_p1 }
 0x31c   : > { %p1175_p4 = por %p1174_p10, %p1173_p9 }
 0x31d   : > { %p1171_p8 = pneg %p1170_p6 }
 0x31e   : > { %p1177_p11 = por %p1176_p5, %p1175_p4 }
 0x320   : > { %p1178_p12 = pnand %p1177_p11, %p1171_p8 }
 0x322   : > { %1181 = shalt.err (!%p1178_p12)
}
 0x323   : > { %815 = dma.vmem_to_hbm [thread:$0]  (%p912_p1), %s813_s14, %s1627_s10, %s1637_s13, %s793_s16  }
 0x324 PF: > { %s824_s9 = sand.u32 1, %s1212_s17   ;;  %p1699_p2 = scmp.ne.s32.totalorder %s1690_s29, 0 }
 0x325   : > { %s825_s6 = scalar_lea.sflag [#allocation5], %s824_s9 }
 0x326   : > { %p1045_p3 = pnand %p895_p0, %p1699_p2 }
 0x328   : > { %1207 = dma.done.wait (!%p1045_p3), %s825_s6, 32  }
 0x329   : > { %1209 = vsyncadd (!%p1045_p3), %s825_s6, 4294967264  ;;  %p19_p13 = scmp.ge.s32.totalorder %s1288_s22, 4   ;;  %s1700_s17 = smov %s1216_s18 }
 0x32a   : > { %s1701_s18 = smov %s1220_s19  ;;  %s1702_s19 = smov %s1300_s25 }
 0x32b   : > { %s1703_s20 = smov %s1288_s22  ;;  %21 = sbr.rel (!%p19_p13) target bundleno = 8 (0x8), region = 85 }
 0x332   :  { %830 = vsyncpa [#allocation4], 1 }
 0x333   :  { %832 = vsyncpa [#allocation4 + $0x1], 1 }
 0x334   :  { %833 = vsyncpa [#allocation7], 1 }
 0x335   :  { %834 = vsyncpa [#allocation5], 1 }
 0x336   :  { %836 = vsyncpa [#allocation5 + $0x1], 1 }

</bundles_post_ra>
